<compile_context>
chip_gen: v5e
topology: v5e:2x2
jax: 0.10.0
libtpu: 0.0.40
codegen_flags: <defaults>
</compile_context>

<pallas_src>
import functools

import jax
import jax.numpy as jnp
from jax.experimental import pallas as pl
from jax.experimental.pallas import tpu as pltpu

SELU_ALPHA = 1.6732632423543772
SELU_SCALE = 1.0507009873554805


def _round_up(x, m):
    return (x + m - 1) // m * m


def _snpn_kernel(x_ref, c_ref,
                 wa_ref, ba_ref,
                 wc_ref,
                 w2_ref, b2_ref,
                 wg_ref, bg_ref,
                 out_ref, *, dout_p):
    x = x_ref[...]          # (tile, Din)   bf16
    c = c_ref[...]          # (tile, Dctx)  bf16

    # Fused skip + fc1:  [residual | h_pre] = x @ [Wskip | W1] + [bskip | b1+bc]
    hr = jnp.dot(x, wa_ref[...], preferred_element_type=jnp.float32) + ba_ref[...]
    residual = hr[:, :dout_p]                                   # (tile, Dout_p) f32
    h = hr[:, dout_p:] + jnp.dot(c, wc_ref[...],                # + context projection
                                 preferred_element_type=jnp.float32)

    # SELU (f32; clamp exp arg so the unselected branch never overflows).
    h = SELU_SCALE * jnp.where(
        h > 0, h, SELU_ALPHA * (jnp.exp(jnp.minimum(h, 0.0)) - 1.0))

    # fc2
    y = jnp.dot(h.astype(jnp.bfloat16), w2_ref[...],
                preferred_element_type=jnp.float32) + b2_ref[...]

    # Dropout: identity in eval mode.
    # TODO(synk): training-mode dropout (random mask via pltpu.prng_*) not implemented.

    # Fused GLU:  [g1 | g2] = y @ [Wg1 | Wg2] + [bg1 | bg2]
    g = jnp.dot(y.astype(jnp.bfloat16), wg_ref[...],
                preferred_element_type=jnp.float32) + bg_ref[...]
    gated = jax.nn.sigmoid(g[:, :dout_p]) * g[:, dout_p:]

    out_ref[...] = (gated + residual).astype(out_ref.dtype)


def snpn_forward(x, context, packed, *, tile_rows=512):
    """x: (B, T, input_size), context: (B, T, hidden_context_size) -> (B, T, output_size)."""
    B, T, Din = x.shape
    Dctx = context.shape[-1]
    Dout = packed["dout"]
    dout_p = packed["w2"].shape[1]          # lane-padded output width

    rows = B * T
    # Big row tiles amortize the ~0.35us/grid-step overhead and fill the MXU M dimension;
    # clamp to the (16-aligned) problem size so tiny inputs don't over-pad.
    tile_rows = max(16, min(tile_rows, _round_up(rows, 16)))
    rows_pad = _round_up(rows, tile_rows)

    x2 = x.reshape(rows, Din).astype(jnp.bfloat16)
    c2 = context.reshape(rows, Dctx).astype(jnp.bfloat16)
    if rows_pad != rows:
        x2 = jnp.pad(x2, ((0, rows_pad - rows), (0, 0)))
        c2 = jnp.pad(c2, ((0, rows_pad - rows), (0, 0)))

    def row_spec(feat):
        return pl.BlockSpec((tile_rows, feat), lambda i: (i, 0))

    def full_spec(arr):
        # Grid-invariant (weights/biases): same block at every grid step.
        return pl.BlockSpec(arr.shape, lambda i: (0, 0))

    weight_args = (packed["wa"], packed["ba"], packed["wc"],
                   packed["w2"], packed["b2"], packed["wg"], packed["bg"])

    out_p = pl.pallas_call(
        functools.partial(_snpn_kernel, dout_p=dout_p),
        out_shape=jax.ShapeDtypeStruct((rows_pad, dout_p), jnp.float32),
        grid_spec=pltpu.PrefetchScalarGridSpec(
            num_scalar_prefetch=0,
            grid=(rows_pad // tile_rows,),
            in_specs=[row_spec(Din), row_spec(Dctx)]
                     + [full_spec(w) for w in weight_args],
            out_specs=row_spec(dout_p),
        ),
        compiler_params=pltpu.CompilerParams(
            dimension_semantics=("parallel",)),
    )(x2, c2, *weight_args)

    return out_p[:rows, :Dout].reshape(B, T, Dout)


def init_params(key, input_size, hidden_size, output_size, context_size):
    """torch.nn.Linear-style init (uniform +-1/sqrt(fan_in)); weights stored (in, out)
    so the kernel computes y = x @ W + b.  Weights bf16, biases f32."""
    def linear(k, fan_in, fan_out):
        k1, k2 = jax.random.split(k)
        bound = 1.0 / jnp.sqrt(fan_in)
        w = jax.random.uniform(k1, (fan_in, fan_out), jnp.float32, -bound, bound)
        b = jax.random.uniform(k2, (1, fan_out), jnp.float32, -bound, bound)
        return w.astype(jnp.bfloat16), b

    keys = jax.random.split(key, 6)
    wskip, bskip = linear(keys[0], input_size, output_size)
    w1, b1 = linear(keys[1], input_size, hidden_size)
    wc, bc = linear(keys[2], context_size, hidden_size)
    w2, b2 = linear(keys[3], hidden_size, output_size)
    wg1, bg1 = linear(keys[4], output_size, output_size)
    wg2, bg2 = linear(keys[5], output_size, output_size)
    return dict(wskip=wskip, bskip=bskip, w1=w1, b1=b1, wc=wc, bc=bc,
                w2=w2, b2=b2, wg1=wg1, bg1=bg1, wg2=wg2, bg2=bg2)


def pack_params(p, input_size, hidden_size, output_size, context_size):
    """One-time weight packing: block-concatenate the six Linear layers into three
    matrices and zero-pad hidden/output feature dims to multiples of 128 so every
    matmul N-dim and every in-kernel slice is lane-aligned."""
    dh_p = _round_up(hidden_size, 128)
    dout_p = _round_up(output_size, 128)
    f32, bf16 = jnp.float32, jnp.bfloat16

    wa = jnp.zeros((input_size, dout_p + dh_p), f32)
    wa = wa.at[:, :output_size].set(p["wskip"].astype(f32))
    wa = wa.at[:, dout_p:dout_p + hidden_size].set(p["w1"].astype(f32))
    ba = jnp.zeros((1, dout_p + dh_p), f32)
    ba = ba.at[:, :output_size].set(p["bskip"])
    ba = ba.at[:, dout_p:dout_p + hidden_size].set(p["b1"] + p["bc"])

    wc = jnp.zeros((context_size, dh_p), f32)
    wc = wc.at[:, :hidden_size].set(p["wc"].astype(f32))

    w2 = jnp.zeros((dh_p, dout_p), f32)
    w2 = w2.at[:hidden_size, :output_size].set(p["w2"].astype(f32))
    b2 = jnp.zeros((1, dout_p), f32).at[:, :output_size].set(p["b2"])

    wg = jnp.zeros((dout_p, 2 * dout_p), f32)
    wg = wg.at[:output_size, :output_size].set(p["wg1"].astype(f32))
    wg = wg.at[:output_size, dout_p:dout_p + output_size].set(p["wg2"].astype(f32))
    bg = jnp.zeros((1, 2 * dout_p), f32)
    bg = bg.at[:, :output_size].set(p["bg1"])
    bg = bg.at[:, dout_p:dout_p + output_size].set(p["bg2"])

    return dict(wa=wa.astype(bf16), ba=ba, wc=wc.astype(bf16),
                w2=w2.astype(bf16), b2=b2, wg=wg.astype(bf16), bg=bg,
                dout=output_size)


def snpn_reference(x, context, p):
    """Pure-JAX reference of the PyTorch forward (eval mode), same bf16 compute path."""
    f32, bf16 = jnp.float32, jnp.bfloat16
    B, T, Din = x.shape
    x2 = x.reshape(-1, Din).astype(bf16)
    c2 = context.reshape(-1, context.shape[-1]).astype(bf16)
    residual = jnp.dot(x2, p["wskip"], preferred_element_type=f32) + p["bskip"]
    h = (jnp.dot(x2, p["w1"], preferred_element_type=f32) + p["b1"]
         + jnp.dot(c2, p["wc"], preferred_element_type=f32) + p["bc"])
    h = SELU_SCALE * jnp.where(h > 0, h, SELU_ALPHA * (jnp.exp(jnp.minimum(h, 0.0)) - 1.0))
    y = jnp.dot(h.astype(bf16), p["w2"], preferred_element_type=f32) + p["b2"]
    g = (jax.nn.sigmoid(jnp.dot(y.astype(bf16), p["wg1"], preferred_element_type=f32) + p["bg1"])
         * (jnp.dot(y.astype(bf16), p["wg2"], preferred_element_type=f32) + p["bg2"]))
    out = g + residual
    return out.reshape(B, T, -1)


if __name__ == "__main__":
    # Small shapes consistent with the module's TimeDistributed (B, T, feat) usage.
    B, T = 2, 8
    input_size, hidden_size, output_size, context_size = 16, 32, 32, 24
    # input_size != output_size -> skip_layer path is exercised; context is provided.

    key = jax.random.PRNGKey(0)
    kx, kc, kp = jax.random.split(key, 3)
    x = jax.random.normal(kx, (B, T, input_size), jnp.float32)
    ctx = jax.random.normal(kc, (B, T, context_size), jnp.float32)

    params = init_params(kp, input_size, hidden_size, output_size, context_size)
    packed = pack_params(params, input_size, hidden_size, output_size, context_size)

    out = snpn_forward(x, ctx, packed)
    out = jax.block_until_ready(out)

    ref = snpn_reference(x, ctx, params)
    assert out.shape == (B, T, output_size)
    assert jnp.allclose(out, ref, atol=1e-3, rtol=1e-3), "mismatch vs reference"

    print("KERNEL_OK")
</pallas_src>

<mosaic_0001>
module attributes {stable_mosaic.version = 11 : i64} {
  func.func @_snpn_kernel(%arg0: i32, %arg1: memref<16x16xbf16, #tpu.memory_space<vmem>>, %arg2: memref<16x24xbf16, #tpu.memory_space<vmem>>, %arg3: memref<16x256xbf16, #tpu.memory_space<vmem>>, %arg4: memref<1x256xf32, #tpu.memory_space<vmem>>, %arg5: memref<24x128xbf16, #tpu.memory_space<vmem>>, %arg6: memref<128x128xbf16, #tpu.memory_space<vmem>>, %arg7: memref<1x128xf32, #tpu.memory_space<vmem>>, %arg8: memref<128x256xbf16, #tpu.memory_space<vmem>>, %arg9: memref<1x256xf32, #tpu.memory_space<vmem>>, %arg10: memref<16x128xf32, #tpu.memory_space<vmem>>) attributes {dimension_semantics = [#tpu.dimension_semantics<parallel>], iteration_bounds = array<i64: 1>, scalar_prefetch = 0 : i64, scratch_operands = 0 : i64, tpu.core_type = #tpu.core_type<tc>, window_params = [{transform_indices = @transform_0, window_bounds = array<i64: 16, 16>}, {transform_indices = @transform_1, window_bounds = array<i64: 16, 24>}, {pipeline_mode = #tpu.pipeline_mode<synchronous>, transform_indices = @transform_2, window_bounds = array<i64: 16, 256>}, {pipeline_mode = #tpu.pipeline_mode<synchronous>, transform_indices = @transform_3, window_bounds = array<i64: 1, 256>}, {pipeline_mode = #tpu.pipeline_mode<synchronous>, transform_indices = @transform_4, window_bounds = array<i64: 24, 128>}, {pipeline_mode = #tpu.pipeline_mode<synchronous>, transform_indices = @transform_5, window_bounds = array<i64: 128, 128>}, {pipeline_mode = #tpu.pipeline_mode<synchronous>, transform_indices = @transform_6, window_bounds = array<i64: 1, 128>}, {pipeline_mode = #tpu.pipeline_mode<synchronous>, transform_indices = @transform_7, window_bounds = array<i64: 128, 256>}, {pipeline_mode = #tpu.pipeline_mode<synchronous>, transform_indices = @transform_8, window_bounds = array<i64: 1, 256>}, {transform_indices = @transform_9, window_bounds = array<i64: 16, 128>}]} {
    %c0 = arith.constant 0 : index
    %c0_0 = arith.constant 0 : index
    %0 = vector.load %arg1[%c0, %c0_0] : memref<16x16xbf16, #tpu.memory_space<vmem>>, vector<16x16xbf16>
    %c0_1 = arith.constant 0 : index
    %c0_2 = arith.constant 0 : index
    %1 = vector.load %arg2[%c0_1, %c0_2] : memref<16x24xbf16, #tpu.memory_space<vmem>>, vector<16x24xbf16>
    %c0_3 = arith.constant 0 : index
    %c0_4 = arith.constant 0 : index
    %2 = vector.load %arg3[%c0_3, %c0_4] : memref<16x256xbf16, #tpu.memory_space<vmem>>, vector<16x256xbf16>
    %cst = arith.constant dense<0.000000e+00> : vector<16x256xf32>
    %3 = tpu.matmul %0, %2, %cst {dimension_numbers = #tpu.dot_dimension_numbers<[1], [0], [0], [1], [0, 0, 1, 1], [], []>} : vector<16x16xbf16>, vector<16x256xbf16>, vector<16x256xf32> -> vector<16x256xf32>
    %c0_5 = arith.constant 0 : index
    %c0_6 = arith.constant 0 : index
    %4 = vector.load %arg4[%c0_5, %c0_6] : memref<1x256xf32, #tpu.memory_space<vmem>>, vector<1x256xf32>
    %5 = vector.broadcast %4 : vector<1x256xf32> to vector<16x256xf32>
    %6 = arith.addf %3, %5 : vector<16x256xf32>
    %7 = vector.extract_strided_slice %6 {offsets = [0, 0], sizes = [16, 128], strides = [1, 1]} : vector<16x256xf32> to vector<16x128xf32>
    %8 = vector.extract_strided_slice %6 {offsets = [0, 128], sizes = [16, 128], strides = [1, 1]} : vector<16x256xf32> to vector<16x128xf32>
    %c0_7 = arith.constant 0 : index
    %c0_8 = arith.constant 0 : index
    %9 = vector.load %arg5[%c0_7, %c0_8] : memref<24x128xbf16, #tpu.memory_space<vmem>>, vector<24x128xbf16>
    %cst_9 = arith.constant dense<0.000000e+00> : vector<16x128xf32>
    %10 = tpu.matmul %1, %9, %cst_9 {dimension_numbers = #tpu.dot_dimension_numbers<[1], [0], [0], [1], [0, 0, 1, 1], [], []>} : vector<16x24xbf16>, vector<24x128xbf16>, vector<16x128xf32> -> vector<16x128xf32>
    %11 = arith.addf %8, %10 : vector<16x128xf32>
    %cst_10 = arith.constant 0.000000e+00 : f32
    %12 = vector.broadcast %cst_10 : f32 to vector<16x128xf32>
    %13 = arith.cmpf ogt, %11, %12 : vector<16x128xf32>
    %cst_11 = arith.constant 0.000000e+00 : f32
    %14 = vector.broadcast %cst_11 : f32 to vector<16x128xf32>
    %15 = arith.minimumf %11, %14 : vector<16x128xf32>
    %16 = math.exp %15 : vector<16x128xf32>
    %cst_12 = arith.constant 1.000000e+00 : f32
    %17 = vector.broadcast %cst_12 : f32 to vector<16x128xf32>
    %18 = arith.subf %16, %17 : vector<16x128xf32>
    %cst_13 = arith.constant 1.67326319 : f32
    %19 = vector.broadcast %cst_13 : f32 to vector<16x128xf32>
    %20 = arith.mulf %19, %18 : vector<16x128xf32>
    %21 = arith.select %13, %11, %20 : vector<16x128xi1>, vector<16x128xf32>
    %cst_14 = arith.constant 1.05070102 : f32
    %22 = vector.broadcast %cst_14 : f32 to vector<16x128xf32>
    %23 = arith.mulf %22, %21 : vector<16x128xf32>
    %24 = arith.truncf %23 : vector<16x128xf32> to vector<16x128xbf16>
    %c0_15 = arith.constant 0 : index
    %c0_16 = arith.constant 0 : index
    %25 = vector.load %arg6[%c0_15, %c0_16] : memref<128x128xbf16, #tpu.memory_space<vmem>>, vector<128x128xbf16>
    %cst_17 = arith.constant dense<0.000000e+00> : vector<16x128xf32>
    %26 = tpu.matmul %24, %25, %cst_17 {dimension_numbers = #tpu.dot_dimension_numbers<[1], [0], [0], [1], [0, 0, 1, 1], [], []>} : vector<16x128xbf16>, vector<128x128xbf16>, vector<16x128xf32> -> vector<16x128xf32>
    %c0_18 = arith.constant 0 : index
    %c0_19 = arith.constant 0 : index
    %27 = vector.load %arg7[%c0_18, %c0_19] : memref<1x128xf32, #tpu.memory_space<vmem>>, vector<1x128xf32>
    %28 = vector.broadcast %27 : vector<1x128xf32> to vector<16x128xf32>
    %29 = arith.addf %26, %28 : vector<16x128xf32>
    %30 = arith.truncf %29 : vector<16x128xf32> to vector<16x128xbf16>
    %c0_20 = arith.constant 0 : index
    %c0_21 = arith.constant 0 : index
    %31 = vector.load %arg8[%c0_20, %c0_21] : memref<128x256xbf16, #tpu.memory_space<vmem>>, vector<128x256xbf16>
    %cst_22 = arith.constant dense<0.000000e+00> : vector<16x256xf32>
    %32 = tpu.matmul %30, %31, %cst_22 {dimension_numbers = #tpu.dot_dimension_numbers<[1], [0], [0], [1], [0, 0, 1, 1], [], []>} : vector<16x128xbf16>, vector<128x256xbf16>, vector<16x256xf32> -> vector<16x256xf32>
    %c0_23 = arith.constant 0 : index
    %c0_24 = arith.constant 0 : index
    %33 = vector.load %arg9[%c0_23, %c0_24] : memref<1x256xf32, #tpu.memory_space<vmem>>, vector<1x256xf32>
    %34 = vector.broadcast %33 : vector<1x256xf32> to vector<16x256xf32>
    %35 = arith.addf %32, %34 : vector<16x256xf32>
    %36 = vector.extract_strided_slice %35 {offsets = [0, 0], sizes = [16, 128], strides = [1, 1]} : vector<16x256xf32> to vector<16x128xf32>
    %37 = arith.negf %36 : vector<16x128xf32>
    %38 = math.exp %37 : vector<16x128xf32>
    %cst_25 = arith.constant 1.000000e+00 : f32
    %39 = vector.broadcast %cst_25 : f32 to vector<16x128xf32>
    %40 = arith.addf %39, %38 : vector<16x128xf32>
    %41 = arith.divf %39, %40 : vector<16x128xf32>
    %42 = vector.extract_strided_slice %35 {offsets = [0, 128], sizes = [16, 128], strides = [1, 1]} : vector<16x256xf32> to vector<16x128xf32>
    %43 = arith.mulf %41, %42 : vector<16x128xf32>
    %44 = arith.addf %43, %7 : vector<16x128xf32>
    %c0_26 = arith.constant 0 : index
    %c0_27 = arith.constant 0 : index
    %45 = vector.load %arg10[%c0_26, %c0_27] : memref<16x128xf32, #tpu.memory_space<vmem>>, vector<16x128xf32>
    tpu.vector_store %arg10[%c0_26, %c0_27], %44 {strides = array<i32>} : memref<16x128xf32, #tpu.memory_space<vmem>>, vector<16x128xf32>,
    return
  }
  func.func @transform_0(%arg0: i32) -> (i32, i32) {
    %c0_i32 = arith.constant 0 : i32
    %c0_i32_0 = arith.constant 0 : i32
    return %arg0, %c0_i32 : i32, i32
  }
  func.func @transform_1(%arg0: i32) -> (i32, i32) {
    %c0_i32 = arith.constant 0 : i32
    %c0_i32_0 = arith.constant 0 : i32
    return %arg0, %c0_i32 : i32, i32
  }
  func.func @transform_2(%arg0: i32) -> (i32, i32) {
    %c0_i32 = arith.constant 0 : i32
    %c0_i32_0 = arith.constant 0 : i32
    %c0_i32_1 = arith.constant 0 : i32
    return %c0_i32, %c0_i32_0 : i32, i32
  }
  func.func @transform_3(%arg0: i32) -> (i32, i32) {
    %c0_i32 = arith.constant 0 : i32
    %c0_i32_0 = arith.constant 0 : i32
    %c0_i32_1 = arith.constant 0 : i32
    return %c0_i32, %c0_i32_0 : i32, i32
  }
  func.func @transform_4(%arg0: i32) -> (i32, i32) {
    %c0_i32 = arith.constant 0 : i32
    %c0_i32_0 = arith.constant 0 : i32
    %c0_i32_1 = arith.constant 0 : i32
    return %c0_i32, %c0_i32_0 : i32, i32
  }
  func.func @transform_5(%arg0: i32) -> (i32, i32) {
    %c0_i32 = arith.constant 0 : i32
    %c0_i32_0 = arith.constant 0 : i32
    %c0_i32_1 = arith.constant 0 : i32
    return %c0_i32, %c0_i32_0 : i32, i32
  }
  func.func @transform_6(%arg0: i32) -> (i32, i32) {
    %c0_i32 = arith.constant 0 : i32
    %c0_i32_0 = arith.constant 0 : i32
    %c0_i32_1 = arith.constant 0 : i32
    return %c0_i32, %c0_i32_0 : i32, i32
  }
  func.func @transform_7(%arg0: i32) -> (i32, i32) {
    %c0_i32 = arith.constant 0 : i32
    %c0_i32_0 = arith.constant 0 : i32
    %c0_i32_1 = arith.constant 0 : i32
    return %c0_i32, %c0_i32_0 : i32, i32
  }
  func.func @transform_8(%arg0: i32) -> (i32, i32) {
    %c0_i32 = arith.constant 0 : i32
    %c0_i32_0 = arith.constant 0 : i32
    %c0_i32_1 = arith.constant 0 : i32
    return %c0_i32, %c0_i32_0 : i32, i32
  }
  func.func @transform_9(%arg0: i32) -> (i32, i32) {
    %c0_i32 = arith.constant 0 : i32
    %c0_i32_0 = arith.constant 0 : i32
    return %arg0, %c0_i32 : i32, i32
  }
}

</mosaic_0001>

<bundles_post_ra>
// kernel: tpu_custom_call.1
= control target key start
LH: loop header
LB: loop body
LE: loop exit
PB: predicated region body
PF: predicated region fallthrough
CT: control target
= control target key end

     0   :  { %14 = vsyncpa [#allocation3], 0  ;;  %s1000_s0 = inlined_call_operand.hbm [shape: bf16[16,16], index: 0, kind: input, shape index: {}]   ;;  %s1001_s1 = inlined_call_operand.hbm [shape: bf16[16,24], index: 1, kind: input, shape index: {}]   ;;  %s1002_s2 = inlined_call_operand.hbm [shape: bf16[16,256], index: 2, kind: input, shape index: {}]   ;;  %s1003_s3 = inlined_call_operand.vmem [shape: f32[1,256], index: 3, kind: input, shape index: {}]   ;;  %s1004_s4 = inlined_call_operand.hbm [shape: bf16[24,128], index: 4, kind: input, shape index: {}]   ;;  %s1005_s5 = inlined_call_operand.hbm [shape: bf16[128,128], index: 5, kind: input, shape index: {}]   ;;  %s1006_s6 = inlined_call_operand.vmem [shape: f32[1,128], index: 6, kind: input, shape index: {}]   ;;  %s1007_s7 = inlined_call_operand.hbm [shape: bf16[128,256], index: 7, kind: input, shape index: {}]   ;;  %s1008_s8 = inlined_call_operand.vmem [shape: f32[1,256], index: 8, kind: input, shape index: {}]   ;;  %s1009_s9 = inlined_call_operand.hbm [shape: f32[16,128], index: 9, kind: output, shape index: {}]  }
   0x1   :  { %15 = vsyncpa [#allocation6], 0 }
   0x2   :  { %16 = vsyncpa [#allocation9], 0 }
   0x3   :  { %17 = vsyncpa [#allocation12], 0 }
   0x4   :  { %18 = vsyncpa [#allocation4], 0  ;;  %s36_s11 = sshll.u32 %s1001_s1, 4  ;;  %s878_s12 = smov [#allocation5]   ;;  %s37_s11 = int_to_ptr.hbm [resolvable:$true] %s36_s11 }
   0x5   :  { %s38_s13 = sshll.u32 %s878_s12, 4  ;;  %s64_s16 = sshll.u32 %s1004_s4, 4  ;;  %s39_s13 = int_to_ptr.vmem [resolvable:$true] %s38_s13  ;;  %s65_s16 = int_to_ptr.hbm [resolvable:$true] %s64_s16 }
   0x6   :  { %s879_s17 = smov 64   ;;  %s880_s18 = smov 4  }
   0x7   :  { %44 = dma.hbm_to_vmem [thread:$0]  %s37_s11, 128, %s39_s13, [#allocation6], %s879_s17, %s879_s17, %s880_s18  }
   0x8   :  { %s881_s19 = smov [#allocation8]   ;;  %s23_s1 = sshll.u32 %s1000_s0, 4  ;;  %s24_s1 = int_to_ptr.hbm [resolvable:$true] %s23_s1 }
   0x9   :  { %s66_s20 = sshll.u32 %s881_s19, 4  ;;  %s49_s24 = sshll.u32 %s1002_s2, 4  ;;  %s67_s20 = int_to_ptr.vmem [resolvable:$true] %s66_s20  ;;  %s50_s24 = int_to_ptr.hbm [resolvable:$true] %s49_s24 }
   0xa   :  { %72 = dma.hbm_to_vmem [thread:$0]  %s65_s16, 192, %s67_s20, [#allocation9], %s879_s17, %s879_s17, %s880_s18  }
   0xb   :  { %s882_s25 = smov [#allocation2]   ;;  %s883_s27 = smov [#allocation7]  }
   0xc   :  { %s25_s26 = sshll.u32 %s882_s25, 4  ;;  %s51_s0 = sshll.u32 %s883_s27, 4  ;;  %s26_s26 = int_to_ptr.vmem [resolvable:$true] %s25_s26  ;;  %s52_s0 = int_to_ptr.vmem [resolvable:$true] %s51_s0 }
   0xd   :  { %31 = dma.hbm_to_vmem [thread:$0]  %s24_s1, 128, %s26_s26, [#allocation3], %s879_s17, %s879_s17, %s880_s18  }
   0xe   :  { %s884_s28 = smov 128   ;;  %s885_s29 = smov 8  }
   0xf   :  { %57 = dma.hbm_to_vmem [thread:$0]  %s50_s24, 256, %s52_s0, [#allocation6], %s884_s28, %s884_s28, %s885_s29  }
  0x10   :  { %s77_s2 = sshll.u32 %s1005_s5, 4  ;;  %s886_s11 = smov [#allocation10]   ;;  %s78_s2 = int_to_ptr.hbm [resolvable:$true] %s77_s2 }
  0x11   :  { %s79_s12 = sshll.u32 %s886_s11, 4  ;;  %s92_s15 = sshll.u32 %s1007_s7, 4  ;;  %s80_s12 = int_to_ptr.vmem [resolvable:$true] %s79_s12  ;;  %s93_s15 = int_to_ptr.hbm [resolvable:$true] %s92_s15 }
  0x12   :  { %85 = dma.hbm_to_vmem [thread:$0]  %s78_s2, 1024, %s80_s12, [#allocation9], %s879_s17, %s879_s17, %s880_s18  }
  0x13   :  { %s887_s16 = smov [#allocation11]  }
  0x14   :  { %s94_s19 = sshll.u32 %s887_s16, 4  ;;  %s95_s19 = int_to_ptr.vmem [resolvable:$true] %s94_s19 }
  0x15   :  { %100 = dma.hbm_to_vmem [thread:$0]  %s93_s15, 2048, %s95_s19, [#allocation12], %s884_s28, %s884_s28, %s885_s29  }
  0x16   :  { %868 = dma.done.wait [#allocation3], 128  }
  0x17   :  { %869 = vsyncadd [#allocation3], 4294967168 }
  0x18   :  { %870 = dma.done.wait [#allocation6], 384  }
  0x19   :  { %871 = vsyncadd [#allocation6], 4294966912 }
  0x1a   :  { %872 = dma.done.wait [#allocation9], 1216  }
  0x1b   :  { %873 = vsyncadd [#allocation9], 4294966080 }
  0x1c   :  { %874 = dma.done.wait [#allocation12], 2048  }
  0x1d   :  { %875 = vsyncadd [#allocation12], 4294965248  ;;  %v530_v0 = vld [vmem:[#allocation7] sm:$0xf]  ;;  %v650_v1 = vld [vmem:[#allocation7 + $0x4] sm:$0xf0] }
  0x1e   :  { %v531_v2 = vor.u32 %v650_v1, %v530_v0  ;;  %v189_v3 = vld [vmem:[#allocation8 + $0x8] sm:$0xf]  ;;  %v649_v4 = vld [vmem:[#allocation7 + $0x4] sm:$0xf]  ;;  %v647_v5 = vld [vmem:[#allocation2] sm:$0xff]  ;;  %vm155_vm0 = vcmask 130048  }
  0x1f   :  { %v200_v6 = vunpack.c.l.b16 %v189_v3  ;;  %v532_v7 = vld [vmem:[#allocation7 + $0x8] sm:$0xf0]  ;;  %vm208_vm1 = vcmask 1043456   ;;  %v651_v11 = vld [vmem:[#allocation8] sm:$0xff]  ;;  %v648_v12 = vld [vmem:[#allocation5] sm:$0xff]  ;;  %vm204_vm2 = vcmask 195584  }
  0x20   :  { %166 = vmatpush.bf16.msra.mxu2 %v531_v2  ;;  %v535_v8 = vor.u32 %v649_v4, %v532_v7  ;;  %v659_v13 = vld [vmem:[#allocation10 + $0x38] sm:$0xff]  ;;  %v658_v14 = vld [vmem:[#allocation10 + $0x30] sm:$0xff]  ;;  %v657_v15 = vld [vmem:[#allocation10 + $0x28] sm:$0xff]  ;;  %s508_s1 = sshll.u32 %s1009_s9, 4  ;;  %s509_s1 = int_to_ptr.hbm [resolvable:$true] %s508_s1 }
  0x21   :  { %v202_v9 = vpack.c.b16 %v200_v6, %v200_v6  ;;  %313 = vmatpush.bf16.msra.mxu3 %v659_v13  ;;  %v656_v16 = vld [vmem:[#allocation10 + $0x20] sm:$0xff]  ;;  %v655_v17 = vld [vmem:[#allocation10 + $0x18] sm:$0xff]  ;;  %v654_v19 = vld [vmem:[#allocation10 + $0x10] sm:$0xff] }
  0x22   :  { %180 = vmatpush.bf16.msra.mxu1 %v535_v8  ;;  %v653_v20 = vld [vmem:[#allocation10 + $0x8] sm:$0xff]  ;;  %v980_v21 = vld [vmem:[%s1003_s3] sm:$0x3]  ;;  %v652_v23 = vld [vmem:[#allocation10] sm:$0xff] }
  0x23   :  { %536 = vmatmul.msk.bf16.vlgmr.msra.gmra.mxu2 %vm155_vm0, %v647_v5  ;;  %v210_v10 = vsel %vm208_vm1, %v202_v9, 0  ;;  %v137_v24 = vperm.slane %v980_v21, 1  ;;  %v639_v27 = vld [vmem:[#allocation11 + $0x70] sm:$0xf]  ;;  %v675_v28 = vld [vmem:[#allocation11 + $0x74] sm:$0xf0] }
  0x24   :  { %218 = vmatpush.bf16.msrb.mxu2 %v210_v10  ;;  %v674_v29 = vld [vmem:[#allocation11 + $0x74] sm:$0xf]  ;;  %v640_v31 = vor.u32 %v675_v28, %v639_v27  ;;  %v641_v32 = vld [vmem:[#allocation11 + $0x78] sm:$0xf0]  ;;  %v631_v33 = vld [vmem:[#allocation11 + $0x60] sm:$0xf] }
  0x25   :  { %537 = vmatmul.msk.bf16.vlgmr.msra.gmra.mxu1 %vm155_vm0, %v647_v5  ;;  %314 = vmatpush.bf16.msra.mxu3 %v658_v14  ;;  %v673_v34 = vld [vmem:[#allocation11 + $0x64] sm:$0xf0]  ;;  %v644_v36 = vor.u32 %v674_v29, %v641_v32  ;;  %v672_v37 = vld [vmem:[#allocation11 + $0x64] sm:$0xf]  ;;  %v633_v38 = vld [vmem:[#allocation11 + $0x68] sm:$0xf0] }
  0x26   :  { %430 = vmatpush.bf16.msra.mxu0 %v640_v31  ;;  %v632_v39 = vor.u32 %v673_v34, %v631_v33  ;;  %v636_v41 = vor.u32 %v672_v37, %v633_v38  ;;  %v623_v42 = vld [vmem:[#allocation11 + $0x50] sm:$0xf]  ;;  %v671_v43 = vld [vmem:[#allocation11 + $0x54] sm:$0xf0]  ;;  %v670_v45 = vld [vmem:[#allocation11 + $0x54] sm:$0xf] }
  0x27   :  { %444 = vmatpush.bf16.msrb.mxu1 %v644_v36  ;;  %v625_v46 = vld [vmem:[#allocation11 + $0x58] sm:$0xf0]  ;;  %v624_v48 = vor.u32 %v671_v43, %v623_v42  ;;  %v615_v51 = vld [vmem:[#allocation11 + $0x40] sm:$0xf]  ;;  %v669_v52 = vld [vmem:[#allocation11 + $0x44] sm:$0xf0] }
  0x28   :  { %219 = vmatpush.bf16.msrb.mxu2 %v651_v11  ;;  %v628_v50 = vor.u32 %v670_v45, %v625_v46  ;;  %v668_v54 = vld [vmem:[#allocation11 + $0x44] sm:$0xf]  ;;  %v617_v55 = vld [vmem:[#allocation11 + $0x48] sm:$0xf0]  ;;  %v616_v57 = vor.u32 %v669_v52, %v615_v51  ;;  %v607_v60 = vld [vmem:[#allocation11 + $0x30] sm:$0xf] }
  0x29   :  { %315 = vmatpush.bf16.msra.mxu3 %v657_v15  ;;  %v620_v59 = vor.u32 %v668_v54, %v617_v55  ;;  %v667_v61 = vld [vmem:[#allocation11 + $0x34] sm:$0xf0]  ;;  %v666_v62 = vld [vmem:[#allocation11 + $0x34] sm:$0xf]  ;;  %v609_v63 = vld [vmem:[#allocation11 + $0x38] sm:$0xf0] }
  0x2a   :  { %431 = vmatpush.bf16.msra.mxu0 %v632_v39  ;;  %v608_v2 = vor.u32 %v667_v61, %v607_v60  ;;  %v612_v3 = vor.u32 %v666_v62, %v609_v63  ;;  %v599_v14 = vld [vmem:[#allocation11 + $0x20] sm:$0xf]  ;;  %v665_v15 = vld [vmem:[#allocation11 + $0x24] sm:$0xf0]  ;;  %v593_v27 = vld [vmem:[#allocation11 + $0x18] sm:$0xf0] }
  0x2b   :  { %445 = vmatpush.bf16.msrb.mxu1 %v636_v41  ;;  %v583_v29 = vld [vmem:[#allocation11] sm:$0xf]  ;;  %v660_v31 = vld [vmem:[#allocation11 + $0x4] sm:$0xf]  ;;  %v585_v33 = vld [vmem:[#allocation11 + $0x8] sm:$0xf0] }
  0x2c   :  { %v588_v34 = vor.u32 %v660_v31, %v585_v33  ;;  %v687_v36 = vld [vmem:[%s1006_s6] ss:$0 sm:$0xff]  ;;  %v136_v61 = vperm.slane %v980_v21, 0  ;;  %s888_s6 = smov [#allocation13]  }
  0x2d   :  { %316 = vmatpush.bf16.msra.mxu3 %v656_v16  ;;  %v664_v16 = vld [vmem:[#allocation11 + $0x24] sm:$0xf]  ;;  %v344_v41 = vld [vmem:[%s1008_s8] sm:$0x3]  ;;  %s506_s8 = sshll.u32 %s888_s6, 4  ;;  %s507_s8 = int_to_ptr.vmem [resolvable:$true] %s506_s8 }
  0x2e   :  { %432 = vmatpush.bf16.msra.mxu0 %v624_v48  ;;  %v346_v42 = vperm.slane %v344_v41, 0 }
  0x2f   :  { %446 = vmatpush.bf16.msrb.mxu1 %v628_v50 }
  0x31   :  { %317 = vmatpush.bf16.msra.mxu3 %v655_v17  ;;  %v600_v17 = vor.u32 %v665_v15, %v599_v14 }
  0x32   :  { %433 = vmatpush.bf16.msra.mxu0 %v616_v57 }
  0x33   :  { %546 = vmatmul.msk.bf16.vlgmr.msrb.gmra.mxu2 %vm204_vm2, %v648_v12  ;;  %447 = vmatpush.bf16.msrb.mxu1 %v620_v59 }
  0x35   :  { %318 = vmatpush.bf16.msra.mxu3 %v654_v19  ;;  %v601_v19 = vld [vmem:[#allocation11 + $0x28] sm:$0xf0] }
  0x36   :  { %434 = vmatpush.bf16.msra.mxu0 %v608_v2 }
  0x37   :  { %448 = vmatpush.bf16.msrb.mxu1 %v612_v3 }
  0x39   :  { %319 = vmatpush.bf16.msra.mxu3 %v653_v20  ;;  %v604_v20 = vor.u32 %v664_v16, %v601_v19 }
  0x3a   :  { %435 = vmatpush.bf16.msra.mxu0 %v600_v17 }
  0x3b   :  { %449 = vmatpush.bf16.msrb.mxu1 %v604_v20 }
  0x3d   :  { %320 = vmatpush.bf16.msra.mxu3 %v652_v23  ;;  %v591_v23 = vld [vmem:[#allocation11 + $0x10] sm:$0xf] }
  0xa2   :  { %v182_v25 = vpop.f32.mrf.mxu1 }
  0xa3   :  { %v183_v26 = vadd.f32 %v182_v25, %v137_v24  ;;  %v662_v25 = vld [vmem:[#allocation11 + $0x14] sm:$0xf] }
  0xa4   :  { %v596_v28 = vor.u32 %v662_v25, %v593_v27 }
  0xa6   :  { %v975_v18 = vpop.f32.mrf.mxu2  ;;  %450 = vmatpush.bf16.msrb.mxu1 %v596_v28 }
  0xaa   :  { %v184_v44 = vpop.f32.mrf.mxu1  ;;  %451 = vmatpush.bf16.msrb.mxu1 %v588_v34 }
  0xab   :  { %v185_v49 = vadd.f32 %v184_v44, %v137_v24  ;;  %v663_v24 = vld [vmem:[#allocation11 + $0x14] sm:$0xf0] }
  0xae   :  { %v982_v22 = vpop.f32.mrf.mxu2 }
  0xb6   :  { %v221_v30 = vpop.f32.mrf.mxu2 }
  0xb7   :  { %v226_v35 = vadd.f32 %v221_v30, %v183_v26  ;;  %v592_v26 = vor.u32 %v663_v24, %v591_v23  ;;  %v661_v30 = vld [vmem:[#allocation11 + $0x4] sm:$0xf0] }
  0xb8   :  { %v584_v32 = vor.u32 %v661_v30, %v583_v29 }
  0xb9   :  { %v230_v40 = vmin.f32 %v226_v35, 0.0  ;;  %vm228_vm3 = vcmp.gt.f32.partialorder %v226_v35, 0.0  ;;  %436 = vmatpush.bf16.msra.mxu0 %v592_v26 }
  0xbb   :  { %v232_v47 = vmul.f32 1.442695, %v230_v40 }
  0xbd   :  { %688 = vpow2.f32 %v232_v47  ;;  %437 = vmatpush.bf16.msra.mxu0 %v584_v32 }
  0xbe   :  { %v223_v53 = vpop.f32.mrf.mxu2 }
  0xbf   :  { %v227_v56 = vadd.f32 %v223_v53, %v185_v49 }
  0xc1   :  { %v231_v58 = vmin.f32 %v227_v56, 0.0  ;;  %vm229_vm4 = vcmp.gt.f32.partialorder %v227_v56, 0.0 }
  0xc3   :  { %v689_v0 = vpop.eup %688  ;;  %v234_v1 = vmul.f32 1.442695, %v231_v58  ;;  %v347_v58 = vperm.slane %v344_v41, 1 }
  0xc4   :  { %v547_v4 = vadd.f32 -1.0, %v689_v0 }
  0xc5   :  { %690 = vpow2.f32 %v234_v1 }
  0xc6   :  { %v238_v5 = vmul.f32 1.6732632, %v547_v4 }
  0xc8   :  { %v240_v9 = vsel %vm228_vm3, %v226_v35, %v238_v5  ;;  %v169_v5 = vadd.f32 %v975_v18, %v136_v61  ;;  %v171_v18 = vadd.f32 %v982_v22, %v136_v61 }
  0xc9   :  { %v242_v11 = vmul.f32 1.050701, %v240_v9 }
  0xcb   :  { %v691_v6 = vpop.eup %690 }
  0xcc   :  { %v548_v7 = vadd.f32 -1.0, %v691_v6 }
  0xce   :  { %v239_v8 = vmul.f32 1.6732632, %v548_v7 }
  0xd0   :  { %v241_v10 = vsel %vm229_vm4, %v227_v56, %v239_v8 }
  0xd1   :  { %v243_v12 = vmul.f32 1.050701, %v241_v10 }
  0xd3   :  { %v244_v13 = vpack.c.bf16 %v243_v12, %v242_v11 }
  0xd5   :  { %321 = vmatmul.bf16.vlgmr.msra.gmra.mxu3 %v244_v13 }
 0x158   :  { %v322_v35 = vpop.f32.mrf.mxu3 }
 0x159   :  { %v323_v38 = vadd.f32 %v687_v36, %v322_v35 }
 0x160   :  { %v324_v37 = vpop.f32.mrf.mxu3 }
 0x161   :  { %v325_v39 = vadd.f32 %v687_v36, %v324_v37 }
 0x163   :  { %v327_v40 = vpack.c.bf16 %v325_v39, %v323_v38 }
 0x165   :  { %438 = vmatmul.bf16.vlgmr.msra.gmra.mxu0 %v327_v40  ;;  %452 = vmatmul.bf16.vlgmr.msrb.gmra.mxu1 %v327_v40 }
 0x1e2   :  { %v439_v43 = vpop.f32.mrf.mxu0  ;;  %v453_v56 = vpop.f32.mrf.mxu1 }
 0x1e3   :  { %v440_v44 = vadd.f32 %v439_v43, %v346_v42  ;;  %v454_v1 = vadd.f32 %v453_v56, %v347_v58 }
 0x1e5   :  { %v645_v45 = vmul.f32 -1.442695, %v440_v44 }
 0x1e7   :  { %692 = vpow2.f32 %v645_v45 }
 0x1ea   :  { %v441_v46 = vpop.f32.mrf.mxu0  ;;  %v455_v21 = vpop.f32.mrf.mxu1 }
 0x1eb   :  { %v442_v47 = vadd.f32 %v441_v46, %v346_v42  ;;  %v456_v14 = vadd.f32 %v455_v21, %v347_v58 }
 0x1ed   :  { %v693_v48 = vpop.eup %692  ;;  %v646_v49 = vmul.f32 -1.442695, %v442_v47 }
 0x1ee   :  { %v464_v50 = vadd.f32 1.0, %v693_v48 }
 0x1ef   :  { %694 = vpow2.f32 %v646_v49 }
 0x1f0   :  { %696 = vrcp.f32 %v464_v50  ;;  %v477_v57 = vand.u32 2147483648, %v464_v50  ;;  %v475_v60 = vand.u32 2147483647, %v464_v50  ;;  %vm471_vm6 = vweird.f32 %v464_v50 }
 0x1f2   :  { %v478_v0 = vor.u32 1.1754944e-38, %v477_v57  ;;  %vm476_vm8 = vcmp.eq.f32.partialorder %v475_v60, 8.507059e+37 }
 0x1f5   :  { %v695_v51 = vpop.eup %694 }
 0x1f6   :  { %v697_v52 = vpop.eup %696  ;;  %v465_v53 = vadd.f32 1.0, %v695_v51 }
 0x1f7   :  { %v467_v54 = vmul.f32 %v697_v52, %v464_v50  ;;  %vm472_vm5 = vweird.f32 %v697_v52 }
 0x1f8   :  { %698 = vrcp.f32 %v465_v53  ;;  %vm473_vm7 = vmor %vm471_vm6, %vm472_vm5  ;;  %v492_v8 = vand.u32 2147483648, %v465_v53  ;;  %v490_v11 = vand.u32 2147483647, %v465_v53  ;;  %vm486_vm10 = vweird.f32 %v465_v53 }
 0x1f9   :  { %v468_v55 = vsub.f32 1.0, %v467_v54 }
 0x1fa   :  { %v493_v13 = vor.u32 1.1754944e-38, %v492_v8  ;;  %vm491_vm12 = vcmp.eq.f32.partialorder %v490_v11, 8.507059e+37 }
 0x1fb   :  { %v469_v59 = vmul.f32 %v697_v52, %v468_v55 }
 0x1fd   :  { %v470_v62 = vadd.f32 %v697_v52, %v469_v59 }
 0x1fe   :  { %v699_v63 = vpop.eup %698 }
 0x1ff   :  { %v474_v2 = vsel %vm473_vm7, %v697_v52, %v470_v62  ;;  %v482_v3 = vmul.f32 %v699_v63, %v465_v53  ;;  %vm487_vm9 = vweird.f32 %v699_v63 }
 0x200   :  { %v479_v4 = vsel %vm476_vm8, %v478_v0, %v474_v2  ;;  %vm488_vm11 = vmor %vm486_vm10, %vm487_vm9 }
 0x201   :  { %v496_v6 = vmul.f32 %v479_v4, %v454_v1  ;;  %v483_v7 = vsub.f32 1.0, %v482_v3 }
 0x203   :  { %v498_v9 = vadd.f32 %v496_v6, %v169_v5  ;;  %v484_v10 = vmul.f32 %v699_v63, %v483_v7 }
 0x205   :  { %500 = vst [vmem:[#allocation13] sm:$0xff] %v498_v9  ;;  %v485_v12 = vadd.f32 %v699_v63, %v484_v10 }
 0x207   :  { %v489_v15 = vsel %vm488_vm11, %v699_v63, %v485_v12 }
 0x208   :  { %v494_v16 = vsel %vm491_vm12, %v493_v13, %v489_v15 }
 0x209   :  { %v497_v17 = vmul.f32 %v494_v16, %v456_v14 }
 0x20b   :  { %v499_v19 = vadd.f32 %v497_v17, %v171_v18 }
 0x20d   :  { %501 = vst [vmem:[#allocation13 + $0x8] sm:$0xff] %v499_v19 }
 0x20e   :  { %514 = dma.vmem_to_hbm [thread:$0]  %s507_s8, 256, %s509_s1, [#allocation4], %s884_s28, %s884_s28, %s885_s29  }
 0x20f   :  { %876 = dma.done.wait [#allocation4], 256  }
 0x210   :  { %877 = vsyncadd [#allocation4], 4294967040 }
 0x211   :  { %519 = vsyncpa [#allocation3], 1 }
 0x212   :  { %520 = vsyncpa [#allocation6], 1 }
 0x213   :  { %521 = vsyncpa [#allocation9], 1 }
 0x214   :  { %522 = vsyncpa [#allocation12], 1 }
 0x215   :  { %523 = vsyncpa [#allocation4], 1 }

</bundles_post_ra>
